<compile_context>
chip_gen: v7x
topology: tpu7x:2x2x1
jax: 0.10.0
libtpu: 0.0.40
codegen_flags: <defaults>
</compile_context>

<pallas_src>
import functools
import math

import jax
import jax.numpy as jnp
from jax.experimental import pallas as pl
from jax.experimental.pallas import tpu as pltpu


def _round_up(n, m):
    return ((n + m - 1) // m) * m


def _default_max_batch_tile():
    # v5e's MXU pass is 128 wide in M -> TB=256 only doubles live intermediates
    # and risks vreg spills; v6e/v7x have a 256x256 MXU -> TB=256 fills M.
    try:
        kind = jax.devices()[0].device_kind.lower()
        if "v5 lite" in kind or "v5e" in kind:
            return 128
    except Exception:
        pass
    return 256


# ----------------------------------------------------------------------------
# Kernel: entire MLP on one batch tile.  Intermediates never touch HBM.
# ----------------------------------------------------------------------------
def _fused_mlp_kernel(x_ref, *refs, num_layers, activation, compute_dtype):
    """x_ref: (TB, In) batch tile.
    refs:  w0, b0, w1, b1, ..., o_ref  — weights padded to lane-dense widths,
           biases (1, Out_pad) in f32, output tile (TB, Out_pad)."""
    o_ref = refs[-1]
    wb = refs[:-1]

    h = x_ref[...].astype(compute_dtype)
    # Static unroll over the fixed layer list (fine at DQN depths).
    # TODO(synk): for deeper equal-width MLPs, stack hidden weights (L, d, d)
    # and iterate with lax.fori_loop to bound the live intermediate set.
    for l in range(num_layers):
        w = wb[2 * l][...]
        b = wb[2 * l + 1][...]
        y = jnp.dot(h, w, preferred_element_type=jnp.float32)   # MXU, f32 acc
        y = y + b.astype(jnp.float32)                           # bias in f32
        if activation == "relu":
            y = jnp.maximum(y, 0.0)
        elif activation == "tanh":
            y = jnp.tanh(y)
        elif activation == "sigmoid":
            y = jax.nn.sigmoid(y)
        # unknown activation string is a no-op, matching the PyTorch module
        h = y.astype(compute_dtype)

    o_ref[...] = h.astype(o_ref.dtype)


# ----------------------------------------------------------------------------
# One-time parameter preparation (hoisted out of the per-call path).
# ----------------------------------------------------------------------------
def prepare_dqn_params(params, compute_dtype=jnp.float32):
    """Pad/cast the (w, b) list ONCE.

    Layer widths (except the very first contraction dim) are padded to
    multiples of 128 so every inter-layer slab and the final store are
    lane-dense; zero-padded weight rows / bias columns keep the math exact.

    Returns (flat_params_tuple, sizes, padded) with sizes/padded as tuples.
    """
    sizes = tuple([params[0][0].shape[0]] + [w.shape[1] for (w, _) in params])
    padded = tuple([sizes[0]] + [_round_up(s, 128) for s in sizes[1:]])

    flat = []
    for l, (w, b) in enumerate(params):
        fin, fout = w.shape
        w_p = (jnp.zeros((padded[l], padded[l + 1]), compute_dtype)
               .at[:fin, :fout].set(w.astype(compute_dtype)))
        b_p = (jnp.zeros((1, padded[l + 1]), jnp.float32)
               .at[0, :fout].set(b.astype(jnp.float32)))
        flat += [w_p, b_p]
    return tuple(flat), sizes, padded


# ----------------------------------------------------------------------------
# Jitted forward: pad batch rows -> single pallas_call -> slice.
# ----------------------------------------------------------------------------
@functools.partial(jax.jit, static_argnames=(
    "sizes", "padded", "activation", "compute_dtype", "max_batch_tile"))
def _dqn_forward(x, flat_params, *, sizes, padded, activation,
                 compute_dtype, max_batch_tile):
    B, In = x.shape
    assert In == sizes[0], "input feature width mismatch"
    num_layers = len(sizes) - 1

    # Batch tiling: rows aligned to the sublane packing of the compute dtype.
    row_align = 16 if jnp.dtype(compute_dtype) == jnp.dtype(jnp.bfloat16) else 8
    TB = min(_round_up(B, row_align), max_batch_tile)
    B_pad = _round_up(B, TB)
    # Keep >=2 grid points when the batch allows it so the "parallel" axis can
    # shard across both TensorCores (v7x megacore).
    if B_pad // TB == 1 and TB >= 2 * row_align:
        TB = _round_up(TB // 2, row_align)
        B_pad = _round_up(B, TB)
    num_tiles = B_pad // TB

    # Pad only the batch rows of x; the contraction dim stays at its natural
    # width (full-array-dim block exception; MXU pads K internally).
    x_c = x.astype(compute_dtype)
    if B_pad != B:
        x_c = jnp.zeros((B_pad, In), compute_dtype).at[:B].set(x_c)

    in_specs = [pl.BlockSpec((TB, In), lambda i: (i, 0))]
    for l in range(num_layers):
        # Constant index_map + Buffered(1): one resident VMEM copy, no
        # double-buffering of parameters across batch tiles.
        in_specs.append(pl.BlockSpec((padded[l], padded[l + 1]),
                                     lambda i: (0, 0),
                                     pipeline_mode=pl.Buffered(1)))
        in_specs.append(pl.BlockSpec((1, padded[l + 1]),
                                     lambda i: (0, 0),
                                     pipeline_mode=pl.Buffered(1)))

    out_pad = padded[-1]

    # VMEM budget (resident params single-buffered + double-buffered x / out
    # tiles + live intermediates); keep headroom under v7x's 64 MiB.
    itemsize = jnp.dtype(compute_dtype).itemsize
    wb_bytes = sum(int(p.size) * p.dtype.itemsize for p in flat_params)
    io_bytes = 2 * TB * In * itemsize + 2 * TB * out_pad * 4
    act_bytes = 2 * TB * max(padded) * 4
    vmem_need = int(wb_bytes + io_bytes + act_bytes)
    assert vmem_need < (56 << 20), (
        f"DQN too large for the all-resident-weights strategy ({vmem_need} B); "
        "use bf16 params or a K-tiled variant.")
    vmem_limit = max(32 << 20, vmem_need + (8 << 20))

    kernel = functools.partial(
        _fused_mlp_kernel, num_layers=num_layers,
        activation=activation, compute_dtype=compute_dtype)

    out_p = pl.pallas_call(
        kernel,
        out_shape=jax.ShapeDtypeStruct((B_pad, out_pad), jnp.float32),
        grid=(num_tiles,),
        in_specs=in_specs,
        out_specs=pl.BlockSpec((TB, out_pad), lambda i: (i, 0)),
        compiler_params=pltpu.CompilerParams(
            dimension_semantics=("parallel",),   # shard batch tiles across TCs
            vmem_limit_bytes=int(vmem_limit)),
    )(x_c, *flat_params)

    # TODO(synk): for very large batches with few real output columns, a
    # masked (B_pad, n_out) store can beat padded-store + slice; at batch up
    # to a few hundred the lane-dense padded store wins.
    return out_p[:B, :sizes[-1]]


def dqn_apply(x, flat_params, sizes, padded, activation_function="relu", *,
              compute_dtype=jnp.float32, max_batch_tile=None):
    """Fast path: call with pre-padded params from prepare_dqn_params()."""
    if max_batch_tile is None:
        max_batch_tile = _default_max_batch_tile()
    return _dqn_forward(x, flat_params, sizes=sizes, padded=padded,
                        activation=activation_function,
                        compute_dtype=compute_dtype,
                        max_batch_tile=int(max_batch_tile))


def dqn_forward(x, params, activation_function="relu", *,
                compute_dtype=jnp.float32, max_batch_tile=None):
    """Convenience one-shot wrapper (pads params every call).
    For repeated calls, use prepare_dqn_params() once + dqn_apply()."""
    flat, sizes, padded = prepare_dqn_params(params, compute_dtype)
    return dqn_apply(x, flat, sizes, padded, activation_function,
                     compute_dtype=compute_dtype, max_batch_tile=max_batch_tile)


def init_dqn_params(key, layer_sizes):
    """PyTorch nn.Linear default init: U(-1/sqrt(fan_in), 1/sqrt(fan_in)).
    Weights stored as (in_features, out_features)."""
    params = []
    for i in range(len(layer_sizes) - 1):
        fan_in, fan_out = layer_sizes[i], layer_sizes[i + 1]
        key, kw, kb = jax.random.split(key, 3)
        bound = 1.0 / math.sqrt(fan_in)
        w = jax.random.uniform(kw, (fan_in, fan_out), jnp.float32, -bound, bound)
        b = jax.random.uniform(kb, (fan_out,), jnp.float32, -bound, bound)
        params.append((w, b))
    return params


if __name__ == "__main__":
    key = jax.random.PRNGKey(0)
    key, kx = jax.random.split(key)

    # Small DQN: layer_sizes = [32, 64, 64, 4], batch = 8
    layer_sizes = [32, 64, 64, 4]
    batch = 8
    x = jax.random.normal(kx, (batch, layer_sizes[0]), jnp.float32)
    params = init_dqn_params(key, layer_sizes)

    # Pre-pad parameters ONCE, then call the jitted fused forward.
    flat_f32, sizes, padded = prepare_dqn_params(params, jnp.float32)

    out_relu = jax.block_until_ready(dqn_apply(x, flat_f32, sizes, padded, "relu"))
    out_tanh = jax.block_until_ready(dqn_apply(x, flat_f32, sizes, padded, "tanh"))
    out_sig = jax.block_until_ready(dqn_apply(x, flat_f32, sizes, padded, "sigmoid"))

    # Plain-JAX references (same math as the PyTorch module: act after every layer)
    ref_relu = ref_tanh = ref_sig = x
    for w, b in params:
        ref_relu = jnp.maximum(ref_relu @ w + b, 0.0)
        ref_tanh = jnp.tanh(ref_tanh @ w + b)
        ref_sig = jax.nn.sigmoid(ref_sig @ w + b)

    assert out_relu.shape == (batch, layer_sizes[-1])
    assert out_tanh.shape == (batch, layer_sizes[-1])
    assert jnp.allclose(out_relu, ref_relu, atol=1e-5, rtol=1e-5), "relu mismatch"
    assert jnp.allclose(out_tanh, ref_tanh, atol=1e-5, rtol=1e-5), "tanh mismatch"
    assert jnp.allclose(out_sig, ref_sig, atol=1e-5, rtol=1e-5), "sigmoid mismatch"

    # bf16 compute path (recommended default on v6e/v7x): looser tolerance.
    flat_bf16, _, _ = prepare_dqn_params(params, jnp.bfloat16)
    out_bf16 = jax.block_until_ready(
        dqn_apply(x, flat_bf16, sizes, padded, "relu", compute_dtype=jnp.bfloat16))
    assert jnp.allclose(out_bf16, ref_relu, atol=5e-2, rtol=5e-2), "bf16 mismatch"

    print("KERNEL_OK")
</pallas_src>

<mosaic_0001>
module attributes {stable_mosaic.version = 11 : i64} {
  func.func @_fused_mlp_kernel(%arg0: i32, %arg1: memref<8x32xf32, #tpu.memory_space<vmem>>, %arg2: memref<32x128xf32, #tpu.memory_space<vmem>>, %arg3: memref<1x128xf32, #tpu.memory_space<vmem>>, %arg4: memref<128x128xf32, #tpu.memory_space<vmem>>, %arg5: memref<1x128xf32, #tpu.memory_space<vmem>>, %arg6: memref<128x128xf32, #tpu.memory_space<vmem>>, %arg7: memref<1x128xf32, #tpu.memory_space<vmem>>, %arg8: memref<8x128xf32, #tpu.memory_space<vmem>>) attributes {dimension_semantics = [#tpu.dimension_semantics<parallel>], iteration_bounds = array<i64: 1>, scalar_prefetch = 0 : i64, scratch_operands = 0 : i64, tpu.core_type = #tpu.core_type<tc>, window_params = [{transform_indices = @transform_0, window_bounds = array<i64: 8, 32>}, {pipeline_mode = #tpu.pipeline_mode<synchronous>, transform_indices = @transform_1, window_bounds = array<i64: 32, 128>}, {pipeline_mode = #tpu.pipeline_mode<synchronous>, transform_indices = @transform_2, window_bounds = array<i64: 1, 128>}, {pipeline_mode = #tpu.pipeline_mode<synchronous>, transform_indices = @transform_3, window_bounds = array<i64: 128, 128>}, {pipeline_mode = #tpu.pipeline_mode<synchronous>, transform_indices = @transform_4, window_bounds = array<i64: 1, 128>}, {pipeline_mode = #tpu.pipeline_mode<synchronous>, transform_indices = @transform_5, window_bounds = array<i64: 128, 128>}, {pipeline_mode = #tpu.pipeline_mode<synchronous>, transform_indices = @transform_6, window_bounds = array<i64: 1, 128>}, {transform_indices = @transform_7, window_bounds = array<i64: 8, 128>}]} {
    %c0 = arith.constant 0 : index
    %c0_0 = arith.constant 0 : index
    %0 = vector.load %arg1[%c0, %c0_0] : memref<8x32xf32, #tpu.memory_space<vmem>>, vector<8x32xf32>
    %c0_1 = arith.constant 0 : index
    %c0_2 = arith.constant 0 : index
    %1 = vector.load %arg2[%c0_1, %c0_2] : memref<32x128xf32, #tpu.memory_space<vmem>>, vector<32x128xf32>
    %c0_3 = arith.constant 0 : index
    %c0_4 = arith.constant 0 : index
    %2 = vector.load %arg3[%c0_3, %c0_4] : memref<1x128xf32, #tpu.memory_space<vmem>>, vector<1x128xf32>
    %cst = arith.constant dense<0.000000e+00> : vector<8x128xf32>
    %3 = tpu.matmul %0, %1, %cst {dimension_numbers = #tpu.dot_dimension_numbers<[1], [0], [0], [1], [0, 0, 1, 1], [], []>} : vector<8x32xf32>, vector<32x128xf32>, vector<8x128xf32> -> vector<8x128xf32>
    %4 = vector.broadcast %2 : vector<1x128xf32> to vector<8x128xf32>
    %5 = arith.addf %3, %4 : vector<8x128xf32>
    %cst_5 = arith.constant 0.000000e+00 : f32
    %6 = vector.broadcast %cst_5 : f32 to vector<8x128xf32>
    %7 = arith.maximumf %5, %6 : vector<8x128xf32>
    %c0_6 = arith.constant 0 : index
    %c0_7 = arith.constant 0 : index
    %8 = vector.load %arg4[%c0_6, %c0_7] : memref<128x128xf32, #tpu.memory_space<vmem>>, vector<128x128xf32>
    %c0_8 = arith.constant 0 : index
    %c0_9 = arith.constant 0 : index
    %9 = vector.load %arg5[%c0_8, %c0_9] : memref<1x128xf32, #tpu.memory_space<vmem>>, vector<1x128xf32>
    %cst_10 = arith.constant dense<0.000000e+00> : vector<8x128xf32>
    %10 = tpu.matmul %7, %8, %cst_10 {dimension_numbers = #tpu.dot_dimension_numbers<[1], [0], [0], [1], [0, 0, 1, 1], [], []>} : vector<8x128xf32>, vector<128x128xf32>, vector<8x128xf32> -> vector<8x128xf32>
    %11 = vector.broadcast %9 : vector<1x128xf32> to vector<8x128xf32>
    %12 = arith.addf %10, %11 : vector<8x128xf32>
    %cst_11 = arith.constant 0.000000e+00 : f32
    %13 = vector.broadcast %cst_11 : f32 to vector<8x128xf32>
    %14 = arith.maximumf %12, %13 : vector<8x128xf32>
    %c0_12 = arith.constant 0 : index
    %c0_13 = arith.constant 0 : index
    %15 = vector.load %arg6[%c0_12, %c0_13] : memref<128x128xf32, #tpu.memory_space<vmem>>, vector<128x128xf32>
    %c0_14 = arith.constant 0 : index
    %c0_15 = arith.constant 0 : index
    %16 = vector.load %arg7[%c0_14, %c0_15] : memref<1x128xf32, #tpu.memory_space<vmem>>, vector<1x128xf32>
    %cst_16 = arith.constant dense<0.000000e+00> : vector<8x128xf32>
    %17 = tpu.matmul %14, %15, %cst_16 {dimension_numbers = #tpu.dot_dimension_numbers<[1], [0], [0], [1], [0, 0, 1, 1], [], []>} : vector<8x128xf32>, vector<128x128xf32>, vector<8x128xf32> -> vector<8x128xf32>
    %18 = vector.broadcast %16 : vector<1x128xf32> to vector<8x128xf32>
    %19 = arith.addf %17, %18 : vector<8x128xf32>
    %cst_17 = arith.constant 0.000000e+00 : f32
    %20 = vector.broadcast %cst_17 : f32 to vector<8x128xf32>
    %21 = arith.maximumf %19, %20 : vector<8x128xf32>
    %c0_18 = arith.constant 0 : index
    %c0_19 = arith.constant 0 : index
    %22 = vector.load %arg8[%c0_18, %c0_19] : memref<8x128xf32, #tpu.memory_space<vmem>>, vector<8x128xf32>
    tpu.vector_store %arg8[%c0_18, %c0_19], %21 {strides = array<i32>} : memref<8x128xf32, #tpu.memory_space<vmem>>, vector<8x128xf32>,
    return
  }
  func.func @transform_0(%arg0: i32) -> (i32, i32) {
    %c0_i32 = arith.constant 0 : i32
    %c0_i32_0 = arith.constant 0 : i32
    return %arg0, %c0_i32 : i32, i32
  }
  func.func @transform_1(%arg0: i32) -> (i32, i32) {
    %c0_i32 = arith.constant 0 : i32
    %c0_i32_0 = arith.constant 0 : i32
    %c0_i32_1 = arith.constant 0 : i32
    return %c0_i32, %c0_i32_0 : i32, i32
  }
  func.func @transform_2(%arg0: i32) -> (i32, i32) {
    %c0_i32 = arith.constant 0 : i32
    %c0_i32_0 = arith.constant 0 : i32
    %c0_i32_1 = arith.constant 0 : i32
    return %c0_i32, %c0_i32_0 : i32, i32
  }
  func.func @transform_3(%arg0: i32) -> (i32, i32) {
    %c0_i32 = arith.constant 0 : i32
    %c0_i32_0 = arith.constant 0 : i32
    %c0_i32_1 = arith.constant 0 : i32
    return %c0_i32, %c0_i32_0 : i32, i32
  }
  func.func @transform_4(%arg0: i32) -> (i32, i32) {
    %c0_i32 = arith.constant 0 : i32
    %c0_i32_0 = arith.constant 0 : i32
    %c0_i32_1 = arith.constant 0 : i32
    return %c0_i32, %c0_i32_0 : i32, i32
  }
  func.func @transform_5(%arg0: i32) -> (i32, i32) {
    %c0_i32 = arith.constant 0 : i32
    %c0_i32_0 = arith.constant 0 : i32
    %c0_i32_1 = arith.constant 0 : i32
    return %c0_i32, %c0_i32_0 : i32, i32
  }
  func.func @transform_6(%arg0: i32) -> (i32, i32) {
    %c0_i32 = arith.constant 0 : i32
    %c0_i32_0 = arith.constant 0 : i32
    %c0_i32_1 = arith.constant 0 : i32
    return %c0_i32, %c0_i32_0 : i32, i32
  }
  func.func @transform_7(%arg0: i32) -> (i32, i32) {
    %c0_i32 = arith.constant 0 : i32
    %c0_i32_0 = arith.constant 0 : i32
    return %arg0, %c0_i32 : i32, i32
  }
}

</mosaic_0001>

<bundles_post_ra>
// kernel: _dqn_forward.1
= control target key start
LH: loop header
LB: loop body
LE: loop exit
PB: predicated region body
PF: predicated region fallthrough
CT: control target
= control target key end

     0   :  { %12 = vsyncpa [#allocation3], 0  ;;  %s782_s0 = inlined_call_operand.hbm [shape: f32[8,32], index: 0, kind: input, shape index: {}]   ;;  %s783_s1 = inlined_call_operand.hbm [shape: f32[32,128], index: 1, kind: input, shape index: {}]   ;;  %s784_s2 = inlined_call_operand.vmem [shape: f32[1,128], index: 2, kind: input, shape index: {}]   ;;  %s785_s3 = inlined_call_operand.hbm [shape: f32[128,128], index: 3, kind: input, shape index: {}]   ;;  %s786_s4 = inlined_call_operand.vmem [shape: f32[1,128], index: 4, kind: input, shape index: {}]   ;;  %s787_s5 = inlined_call_operand.hbm [shape: f32[128,128], index: 5, kind: input, shape index: {}]   ;;  %s788_s6 = inlined_call_operand.vmem [shape: f32[1,128], index: 6, kind: input, shape index: {}]   ;;  %s789_s7 = inlined_call_operand.vmem [shape: f32[8,128], index: 7, kind: output, shape index: {}]  }
   0x1   :  { %13 = vsyncpa [#allocation5], 0 }
   0x2   :  { %14 = vsyncpa [#allocation8], 0  ;;  %s643_s24 = smov [#allocation4]   ;;  %s549_s28 = scalar_lea.hbm %s783_s1, 512 }
   0x3   :  { %s30_s25 = sshll.u32 %s643_s24, 4  ;;  %p550_p0 = scmp.ne.s32.totalorder %s783_s1, %s549_s28  ;;  %s31_s25 = int_to_ptr.vmem [resolvable:$true] %s30_s25 }
   0x4   :  { %p553_p1 = scmp.lt.u32.totalorder %s549_s28, %s783_s1 }
   0x6   :  { %p555_p2 = pnand %p553_p1, %p550_p0 }
   0x8   :  { %558 = shalt.err (!%p555_p2)
}
   0x9   :  { %s559_s10 = scalar_lea.vmem %s31_s25, 512  ;;  %p564_p4 = scmp.lt.s32.totalorder %s31_s25, %s31_s25 }
   0xa   :  { %p560_p3 = scmp.ne.s32.totalorder %s31_s25, %s559_s10  ;;  %p565_p5 = scmp.lt.s32.totalorder %s559_s10, %s559_s10 }
   0xc   :  { %p566_p6 = por %p565_p5, %p564_p4 }
   0xe   :  { %p567_p7 = pnand %p566_p6, %p560_p3 }
  0x10   :  { %570 = shalt.err (!%p567_p7)
}
  0x11   :  { %s644_s11 = smov 128   ;;  %s645_s12 = smov 8  }
  0x12   :  { %36 = dma.hbm_to_vmem [thread:$0]  %s783_s1, 512, %s31_s25, [#allocation5], %s644_s11, %s644_s11, %s645_s12  }
  0x13   :  { %s646_s15 = smov [#allocation2]   ;;  %s647_s17 = smov [#allocation6]  }
  0x14   :  { %s21_s16 = sshll.u32 %s646_s15, 4  ;;  %s44_s18 = sshll.u32 %s647_s17, 4  ;;  %s22_s16 = int_to_ptr.vmem [resolvable:$true] %s21_s16  ;;  %s45_s18 = int_to_ptr.vmem [resolvable:$true] %s44_s18 }
  0x15   :  { %s571_s21 = scalar_lea.hbm %s782_s0, 128 }
  0x16   :  { %p572_p8 = scmp.ne.s32.totalorder %s782_s0, %s571_s21  ;;  %p575_p9 = scmp.lt.u32.totalorder %s571_s21, %s782_s0 }
  0x18   :  { %p577_p10 = pnand %p575_p9, %p572_p8 }
  0x1a   :  { %580 = shalt.err (!%p577_p10)
}
  0x1b   :  { %s581_s1 = scalar_lea.vmem %s22_s16, 128  ;;  %p586_p12 = scmp.lt.s32.totalorder %s22_s16, %s22_s16 }
  0x1c   :  { %p582_p11 = scmp.ne.s32.totalorder %s22_s16, %s581_s1  ;;  %p587_p13 = scmp.lt.s32.totalorder %s581_s1, %s581_s1 }
  0x1e   :  { %p588_p0 = por %p587_p13, %p586_p12 }
  0x20   :  { %p589_p1 = pnand %p588_p0, %p582_p11 }
  0x22   :  { %592 = shalt.err (!%p589_p1)
}
  0x23   :  { %24 = dma.hbm_to_vmem [thread:$0]  %s782_s0, 128, %s22_s16, [#allocation3]  }
  0x24   :  { %s593_s30 = scalar_lea.hbm %s785_s3, 2048 }
  0x25   :  { %p594_p2 = scmp.ne.s32.totalorder %s785_s3, %s593_s30  ;;  %p597_p3 = scmp.lt.u32.totalorder %s593_s30, %s785_s3 }
  0x27   :  { %p599_p4 = pnand %p597_p3, %p594_p2 }
  0x29   :  { %602 = shalt.err (!%p599_p4)
}
  0x2a   :  { %s603_s14 = scalar_lea.vmem %s45_s18, 2048  ;;  %p608_p6 = scmp.lt.s32.totalorder %s45_s18, %s45_s18 }
  0x2b   :  { %p604_p5 = scmp.ne.s32.totalorder %s45_s18, %s603_s14  ;;  %p609_p7 = scmp.lt.s32.totalorder %s603_s14, %s603_s14 }
  0x2d   :  { %p610_p8 = por %p609_p7, %p608_p6 }
  0x2f   :  { %p611_p9 = pnand %p610_p8, %p604_p5 }
  0x31   :  { %614 = shalt.err (!%p611_p9)
}
  0x32   :  { %50 = dma.hbm_to_vmem [thread:$0]  %s785_s3, 2048, %s45_s18, [#allocation5], %s644_s11, %s644_s11, %s645_s12  }
  0x33   :  { %s648_s16 = smov [#allocation7]   ;;  %s615_s21 = scalar_lea.hbm %s787_s5, 2048 }
  0x34   :  { %s58_s17 = sshll.u32 %s648_s16, 4  ;;  %p616_p10 = scmp.ne.s32.totalorder %s787_s5, %s615_s21  ;;  %s59_s17 = int_to_ptr.vmem [resolvable:$true] %s58_s17 }
  0x35   :  { %p619_p11 = scmp.lt.u32.totalorder %s615_s21, %s787_s5 }
  0x37   :  { %p621_p12 = pnand %p619_p11, %p616_p10 }
  0x39   :  { %624 = shalt.err (!%p621_p12)
}
  0x3a   :  { %s625_s1 = scalar_lea.vmem %s59_s17, 2048  ;;  %p630_p0 = scmp.lt.s32.totalorder %s59_s17, %s59_s17 }
  0x3b   :  { %p626_p13 = scmp.ne.s32.totalorder %s59_s17, %s625_s1  ;;  %p631_p1 = scmp.lt.s32.totalorder %s625_s1, %s625_s1 }
  0x3d   :  { %p632_p2 = por %p631_p1, %p630_p0 }
  0x3f   :  { %p633_p3 = pnand %p632_p2, %p626_p13 }
  0x41   :  { %636 = shalt.err (!%p633_p3)
}
  0x42   :  { %64 = dma.hbm_to_vmem [thread:$0]  %s787_s5, 2048, %s59_s17, [#allocation8], %s644_s11, %s644_s11, %s645_s12  }
  0x43   :  { %637 = dma.done.wait [#allocation3], 128  }
  0x44   :  { %638 = vsyncadd [#allocation3], 4294967168 }
  0x45   :  { %639 = dma.done.wait [#allocation5], 2560  }
  0x46   :  { %640 = vsyncadd [#allocation5], 4294964736 }
  0x47   :  { %641 = dma.done.wait [#allocation8], 2048  }
  0x48   :  { %642 = vsyncadd [#allocation8], 4294965248  ;;  %v649_v0 = vmov 0.0|0.0   ;;  %vm650_vm0 = vmmov 0   ;;  %v651_v1 = vmov 0.0   ;;  %v80_v2 = vld [vmem:[#allocation4] sm:$0xff] }
  0x49   :  { %486 = vmatprep.subr.bf16.mxu0 %v649_v0  ;;  %413 = vmatprep.mubr.msk.f32.mxu0 %vm650_vm0, %v651_v1  ;;  %v81_v3 = vld [vmem:[#allocation4 + $0x8] sm:$0xff]  ;;  %v82_v4 = vld [vmem:[#allocation4 + $0x10] sm:$0xff]  ;;  %v83_v6 = vld [vmem:[#allocation4 + $0x18] sm:$0xff]  ;;  %vm91_vm1 = vcmask 261120  }
  0x4a   :  { %492 = vmatprep.subr.bf16.mxu1 %v649_v0  ;;  %448 = vmatprep.mubr.msk.f32.mxu1 %vm650_vm0, %v651_v1  ;;  %v487_v5 = vpack.c.bf16 %v81_v3, %v80_v2  ;;  %v166_v7 = vld [vmem:[#allocation6] sm:$0xff]  ;;  %v167_v8 = vld [vmem:[#allocation6 + $0x8] sm:$0xff]  ;;  %v168_v9 = vld [vmem:[#allocation6 + $0x10] sm:$0xff]  ;;  %v490_v11 = vpack.c.bf16 %v83_v6, %v82_v4 }
  0x4b   :  { %v169_v10 = vld [vmem:[#allocation6 + $0x18] sm:$0xff]  ;;  %v493_v12 = vpack.c.bf16 %v167_v8, %v166_v7  ;;  %v170_v14 = vld [vmem:[#allocation6 + $0x20] sm:$0xff]  ;;  %v171_v15 = vld [vmem:[#allocation6 + $0x28] sm:$0xff] }
  0x4c   :  { %488 = vmatpush3.bf16.msra.mxu0 %v487_v5  ;;  %v496_v13 = vpack.c.bf16 %v169_v10, %v168_v9  ;;  %v79_v16 = vld [vmem:[#allocation2] sm:$0xff]  ;;  %v499_v17 = vpack.c.bf16 %v171_v15, %v170_v14  ;;  %v172_v18 = vld [vmem:[#allocation6 + $0x30] sm:$0xff]  ;;  %v174_v21 = vld [vmem:[#allocation6 + $0x40] sm:$0xff] }
  0x4d   :  { %489 = vmatprep.subr.bf16.mxu0 %v649_v0  ;;  %494 = vmatpush3.bf16.msra.mxu1 %v493_v12  ;;  %v173_v19 = vld [vmem:[#allocation6 + $0x38] sm:$0xff]  ;;  %v175_v22 = vld [vmem:[#allocation6 + $0x48] sm:$0xff]  ;;  %v176_v24 = vld [vmem:[#allocation6 + $0x50] sm:$0xff] }
  0x4e   :  { %495 = vmatprep.subr.bf16.mxu1 %v649_v0  ;;  %v502_v20 = vpack.c.bf16 %v173_v19, %v172_v18  ;;  %v505_v23 = vpack.c.bf16 %v175_v22, %v174_v21  ;;  %v177_v25 = vld [vmem:[#allocation6 + $0x58] sm:$0xff]  ;;  %v178_v27 = vld [vmem:[#allocation6 + $0x60] sm:$0xff]  ;;  %v179_v28 = vld [vmem:[#allocation6 + $0x68] sm:$0xff] }
  0x4f   :  { %v508_v26 = vpack.c.bf16 %v177_v25, %v176_v24  ;;  %v511_v29 = vpack.c.bf16 %v179_v28, %v178_v27  ;;  %v180_v30 = vld [vmem:[#allocation6 + $0x70] sm:$0xff]  ;;  %v181_v31 = vld [vmem:[#allocation6 + $0x78] sm:$0xff]  ;;  %v260_v33 = vld [vmem:[#allocation7] sm:$0xff] }
  0x50   :  { %491 = vmatpush3.bf16.msra.mxu0 %v490_v11  ;;  %v514_v32 = vpack.c.bf16 %v181_v31, %v180_v30  ;;  %v261_v34 = vld [vmem:[#allocation7 + $0x8] sm:$0xff]  ;;  %v262_v35 = vld [vmem:[#allocation7 + $0x10] sm:$0xff]  ;;  %v263_v37 = vld [vmem:[#allocation7 + $0x18] sm:$0xff] }
  0x51   :  { %516 = vmatprep.subr.bf16.mxu0 %v649_v0  ;;  %497 = vmatpush3.bf16.msra.mxu1 %v496_v13  ;;  %v517_v36 = vpack.c.bf16 %v261_v34, %v260_v33  ;;  %v520_v38 = vpack.c.bf16 %v263_v37, %v262_v35  ;;  %v264_v39 = vld [vmem:[#allocation7 + $0x20] sm:$0xff]  ;;  %v265_v40 = vld [vmem:[#allocation7 + $0x28] sm:$0xff]  ;;  %v266_v42 = vld [vmem:[#allocation7 + $0x30] sm:$0xff] }
  0x52   :  { %498 = vmatprep.subr.bf16.mxu1 %v649_v0  ;;  %v523_v41 = vpack.c.bf16 %v265_v40, %v264_v39  ;;  %v267_v43 = vld [vmem:[#allocation7 + $0x38] sm:$0xff]  ;;  %v268_v45 = vld [vmem:[#allocation7 + $0x40] sm:$0xff]  ;;  %v269_v46 = vld [vmem:[#allocation7 + $0x48] sm:$0xff] }
  0x53   :  { %414 = vmatmul.mubr.msk.f32.vlgmr.msra.gmra.mrb[0].mxu0 %vm91_vm1, %v79_v16  ;;  %v526_v44 = vpack.c.bf16 %v267_v43, %v266_v42  ;;  %v529_v47 = vpack.c.bf16 %v269_v46, %v268_v45  ;;  %v270_v48 = vld [vmem:[#allocation7 + $0x50] sm:$0xff]  ;;  %v271_v49 = vld [vmem:[#allocation7 + $0x58] sm:$0xff]  ;;  %v272_v51 = vld [vmem:[#allocation7 + $0x60] sm:$0xff] }
  0x54   :  { %483 = vmatprep.mubr.msk.f32.mxu0 %vm650_vm0, %v651_v1  ;;  %518 = vmatpush3.bf16.msra.mxu0 %v517_v36  ;;  %v532_v50 = vpack.c.bf16 %v271_v49, %v270_v48  ;;  %v273_v52 = vld [vmem:[#allocation7 + $0x68] sm:$0xff]  ;;  %v362_v54 = vld [vmem:[%s784_s2] ss:$0 sm:$0xff]  ;;  %v274_v59 = vld [vmem:[#allocation7 + $0x70] sm:$0xff] }
  0x55   :  { %500 = vmatpush3.bf16.msra.mxu1 %v499_v17  ;;  %519 = vmatprep.subr.bf16.mxu0 %v649_v0  ;;  %v535_v53 = vpack.c.bf16 %v273_v52, %v272_v51  ;;  %v275_v60 = vld [vmem:[#allocation7 + $0x78] sm:$0xff] }
  0x56   :  { %501 = vmatprep.subr.bf16.mxu1 %v649_v0  ;;  %v538_v61 = vpack.c.bf16 %v275_v60, %v274_v59  ;;  %v364_v62 = vld [vmem:[%s786_s4] ss:$0 sm:$0xff] }
  0x57   :  { %v365_v3 = vld [vmem:[%s788_s6] ss:$0 sm:$0xff] }
  0x58   :  { %521 = vmatpush3.bf16.msra.mxu0 %v520_v38 }
  0x59   :  { %503 = vmatpush3.bf16.msra.mxu1 %v502_v20  ;;  %522 = vmatprep.subr.bf16.mxu0 %v649_v0 }
  0x5a   :  { %504 = vmatprep.subr.bf16.mxu1 %v649_v0 }
  0x5c   :  { %524 = vmatpush3.bf16.msra.mxu0 %v523_v41 }
  0x5d   :  { %506 = vmatpush3.bf16.msra.mxu1 %v505_v23  ;;  %525 = vmatprep.subr.bf16.mxu0 %v649_v0 }
  0x5e   :  { %507 = vmatprep.subr.bf16.mxu1 %v649_v0 }
  0x60   :  { %527 = vmatpush3.bf16.msra.mxu0 %v526_v44 }
  0x61   :  { %509 = vmatpush3.bf16.msra.mxu1 %v508_v26  ;;  %528 = vmatprep.subr.bf16.mxu0 %v649_v0 }
  0x62   :  { %510 = vmatprep.subr.bf16.mxu1 %v649_v0 }
  0x64   :  { %530 = vmatpush3.bf16.msra.mxu0 %v529_v47 }
  0x65   :  { %512 = vmatpush3.bf16.msra.mxu1 %v511_v29  ;;  %531 = vmatprep.subr.bf16.mxu0 %v649_v0 }
  0x66   :  { %513 = vmatprep.subr.bf16.mxu1 %v649_v0 }
  0x68   :  { %533 = vmatpush3.bf16.msra.mxu0 %v532_v50 }
  0x69   :  { %515 = vmatpush3.bf16.msra.mxu1 %v514_v32  ;;  %534 = vmatprep.subr.bf16.mxu0 %v649_v0 }
  0x6c   :  { %536 = vmatpush3.bf16.msra.mxu0 %v535_v53 }
  0x6d   :  { %537 = vmatprep.subr.bf16.mxu0 %v649_v0 }
  0x70   :  { %539 = vmatpush3.bf16.msra.mxu0 %v538_v61 }
 0x126   :  { %v161_v55 = vpop.f32.mrb[0].mxu0 }
 0x127   :  { %v162_v56 = vadd.f32 %v362_v54, %v161_v55  ;;  %v415_v57 = vpop.f32.mrb[1].mxu0 }
 0x129   :  { %v165_v58 = vmax.f32 %v162_v56, 0.0 }
 0x12b   :  { %449 = vmatmul.mubr.f32.vlgmr.msra.gmra.mrb[0].mxu1 %v165_v58 }
 0x1fe   :  { %v255_v63 = vpop.f32.mrb[0].mxu1 }
 0x1ff   :  { %v256_v1 = vadd.f32 %v364_v62, %v255_v63  ;;  %v450_v0 = vpop.f32.mrb[1].mxu1 }
 0x201   :  { %v259_v2 = vmax.f32 %v256_v1, 0.0 }
 0x203   :  { %484 = vmatmul.mubr.f32.vlgmr.msra.gmra.mrb[2].mxu0 %v259_v2 }
 0x2d6   :  { %v349_v4 = vpop.f32.mrb[2].mxu0 }
 0x2d7   :  { %v350_v5 = vadd.f32 %v365_v3, %v349_v4  ;;  %v485_v6 = vpop.f32.mrb[3].mxu0 }
 0x2d9   :  { %v353_v7 = vmax.f32 %v350_v5, 0.0 }
 0x2db   :  { %354 = vst [vmem:[%s789_s7] sm:$0xff] %v353_v7 }
 0x2dc   :  { %359 = vsyncpa [#allocation3], 1 }
 0x2dd   :  { %360 = vsyncpa [#allocation5], 1 }
 0x2de   :  { %361 = vsyncpa [#allocation8], 1 }

</bundles_post_ra>
